<compile_context>
chip_gen: v7x
topology: tpu7x:2x2x1
jax: 0.10.0
libtpu: 0.0.40
codegen_flags: <defaults>
</compile_context>

<pallas_src>
import jax
import jax.numpy as jnp
from jax.experimental import pallas as pl
from jax.experimental.pallas import tpu as pltpu


def fused_parametrized_net_kernel(xT_ref, zT_ref, wkr_ref, wbx_ref, wbz_ref,
                                  bhb_ref, out_ref):
    f32 = jnp.float32
    E, tB = xT_ref.shape          # batch tile tB sits on the lane axis
    L = zT_ref.shape[0]

    x_t = xT_ref[...]             # (E, tB)
    z_t = zT_ref[...]             # (L, tB)

    # Row-wise Khatri-Rao product with batch on lanes:
    #   kr[i*L + l, b] = x_t[i, b] * z_t[l, b]
    # built from two sublane broadcasts (no HBM one-hot matrices, no helper
    # matmuls) and one VPU elementwise multiply.
    x_exp = jnp.broadcast_to(x_t[:, None, :], (E, L, tB)).reshape(E * L, tB)
    z_til = jnp.broadcast_to(z_t[None, :, :], (E, L, tB)).reshape(E * L, tB)
    kr = x_exp * z_til                                            # (E*L, tB)

    acc = jnp.dot(wkr_ref[...], kr, preferred_element_type=f32)   # term A
    acc = acc + jnp.dot(wbx_ref[...], x_t, preferred_element_type=f32)  # B
    acc = acc + jnp.dot(wbz_ref[...], z_t, preferred_element_type=f32)  # C
    acc = acc + bhb_ref[...]                                            # D
    out_ref[...] = acc.astype(out_ref.dtype)


def prepack_hypernet_params(wh, bh, equivariant_size):
    """One-time repack of the static HyperNet parameters (call once, reuse)."""
    E = int(equivariant_size)
    L = wh.shape[1]
    wh = jnp.asarray(wh, jnp.float32)
    bh = jnp.asarray(bh, jnp.float32)
    # Wkr[j, i*L + l] = Wh[j*E + i, l]
    wkr = wh[: E * E, :].reshape(E, E * L)
    # Wbx[j, i] = bh[j*E + i]
    wbx = bh[: E * E].reshape(E, E)
    # Wbz[j, l] = Wh[E*E + j, l]
    wbz = wh[E * E:, :]
    # bhb[j] = bh[E*E + j]
    bhb = bh[E * E:].reshape(E, 1)
    return wkr, wbx, wbz, bhb


def _pick_batch_tile(B):
    # Lane-dense tiles (multiples of 128).  Large tiles amortize the ~0.35us
    # per-grid-step overhead of this low-intensity streaming kernel; the cap
    # bounds vreg/VMEM pressure of the (E*L, tB) Khatri-Rao temporary and
    # keeps >=2 grid steps for large B (megacore sharding on v7x).
    if B > 4096:
        return 1024
    if B > 1024:
        return 512
    return 256


def parametrized_net_forward(x, z, packed):
    wkr, wbx, wbz, bhb = packed
    E = wbx.shape[0]
    L = wbz.shape[1]
    B = x.shape[0]
    assert x.shape[1] == E and z.shape[1] == L

    tB = _pick_batch_tile(B)
    n_blocks = pl.cdiv(B, tB)
    B_pad = n_blocks * tB

    # Batch onto the lane axis; pad to a whole number of lane-dense tiles.
    x_t = jnp.pad(x.astype(jnp.float32).T, ((0, 0), (0, B_pad - B)))  # (E, B_pad)
    z_t = jnp.pad(z.astype(jnp.float32).T, ((0, 0), (0, B_pad - B)))  # (L, B_pad)

    batch_spec = lambda rows: pl.BlockSpec((rows, tB), lambda i: (0, i))
    const_spec = lambda shape: pl.BlockSpec(shape, lambda i: (0, 0))

    out_t = pl.pallas_call(
        fused_parametrized_net_kernel,
        out_shape=jax.ShapeDtypeStruct((E, B_pad), jnp.float32),
        grid=(n_blocks,),
        in_specs=[
            batch_spec(E),            # x^T tile
            batch_spec(L),            # z^T tile
            const_spec((E, E * L)),   # Wkr   (hypernet weight -> weight part)
            const_spec((E, E)),       # Wbx   (hypernet bias   -> weight part)
            const_spec((E, L)),       # Wbz   (hypernet weight -> bias part)
            const_spec((E, 1)),       # bhb   (hypernet bias   -> bias part)
        ],
        out_specs=batch_spec(E),
        compiler_params=pltpu.CompilerParams(
            dimension_semantics=("parallel",)),
    )(x_t, z_t, wkr, wbx, wbz, bhb)

    return out_t[:, :B].T            # (B, E)


def reference_forward(x, z, wh, bh, E):
    weights = z @ wh.T + bh
    B = x.shape[0]
    w = weights[:, : E * E].reshape(B, E, E)
    b = weights[:, E * E:]
    return jnp.einsum("bi,bji->bj", x, w) + b


if __name__ == "__main__":
    B = 4            # batch
    E = 8            # equivariant_size
    L = 16           # latent_size
    P = E * E + E    # hypernet output size (72)

    key = jax.random.PRNGKey(0)
    kx, kz, kw, kb = jax.random.split(key, 4)
    x = jax.random.normal(kx, (B, E), dtype=jnp.float32)
    z = jax.random.normal(kz, (B, L), dtype=jnp.float32)
    # deterministic HyperNet (nn.Linear(L, P)) parameters
    wh = (jax.random.uniform(kw, (P, L), dtype=jnp.float32) - 0.5) * (2.0 / jnp.sqrt(L))
    bh = (jax.random.uniform(kb, (P,), dtype=jnp.float32) - 0.5) * (2.0 / jnp.sqrt(L))

    # One-time static repack (not re-executed per forward call).
    packed = prepack_hypernet_params(wh, bh, E)
    fwd = jax.jit(parametrized_net_forward)

    out = jax.block_until_ready(fwd(x, z, packed))

    ref = reference_forward(x, z, wh, bh, E)
    assert out.shape == (B, E)
    assert jnp.allclose(out, ref, atol=1e-4, rtol=1e-4), "mismatch vs reference"

    print("KERNEL_OK")
</pallas_src>

<mosaic_0001>
module attributes {stable_mosaic.version = 11 : i64} {
  func.func @fused_parametrized_net_kernel(%arg0: i32, %arg1: memref<8x256xf32, #tpu.memory_space<vmem>>, %arg2: memref<16x256xf32, #tpu.memory_space<vmem>>, %arg3: memref<8x128xf32, #tpu.memory_space<vmem>>, %arg4: memref<8x8xf32, #tpu.memory_space<vmem>>, %arg5: memref<8x16xf32, #tpu.memory_space<vmem>>, %arg6: memref<8x1xf32, #tpu.memory_space<vmem>>, %arg7: memref<8x256xf32, #tpu.memory_space<vmem>>) attributes {dimension_semantics = [#tpu.dimension_semantics<parallel>], iteration_bounds = array<i64: 1>, scalar_prefetch = 0 : i64, scratch_operands = 0 : i64, tpu.core_type = #tpu.core_type<tc>, window_params = [{transform_indices = @transform_0, window_bounds = array<i64: 8, 256>}, {transform_indices = @transform_1, window_bounds = array<i64: 16, 256>}, {pipeline_mode = #tpu.pipeline_mode<synchronous>, transform_indices = @transform_2, window_bounds = array<i64: 8, 128>}, {pipeline_mode = #tpu.pipeline_mode<synchronous>, transform_indices = @transform_3, window_bounds = array<i64: 8, 8>}, {pipeline_mode = #tpu.pipeline_mode<synchronous>, transform_indices = @transform_4, window_bounds = array<i64: 8, 16>}, {pipeline_mode = #tpu.pipeline_mode<synchronous>, transform_indices = @transform_5, window_bounds = array<i64: 8, 1>}, {transform_indices = @transform_6, window_bounds = array<i64: 8, 256>}]} {
    %c0 = arith.constant 0 : index
    %c0_0 = arith.constant 0 : index
    %0 = vector.load %arg1[%c0, %c0_0] : memref<8x256xf32, #tpu.memory_space<vmem>>, vector<8x256xf32>
    %c0_1 = arith.constant 0 : index
    %c0_2 = arith.constant 0 : index
    %1 = vector.load %arg2[%c0_1, %c0_2] : memref<16x256xf32, #tpu.memory_space<vmem>>, vector<16x256xf32>
    %2 = vector.shape_cast %0 : vector<8x256xf32> to vector<8x1x256xf32>
    %3 = vector.shape_cast %2 : vector<8x1x256xf32> to vector<8x1x256xf32>
    %4 = vector.broadcast %3 : vector<8x1x256xf32> to vector<8x16x256xf32>
    %5 = vector.shape_cast %4 : vector<8x16x256xf32> to vector<128x256xf32>
    %6 = vector.shape_cast %1 : vector<16x256xf32> to vector<1x16x256xf32>
    %7 = vector.shape_cast %6 : vector<1x16x256xf32> to vector<1x16x256xf32>
    %8 = vector.broadcast %7 : vector<1x16x256xf32> to vector<8x16x256xf32>
    %9 = vector.shape_cast %8 : vector<8x16x256xf32> to vector<128x256xf32>
    %10 = arith.mulf %5, %9 : vector<128x256xf32>
    %c0_3 = arith.constant 0 : index
    %c0_4 = arith.constant 0 : index
    %11 = vector.load %arg3[%c0_3, %c0_4] : memref<8x128xf32, #tpu.memory_space<vmem>>, vector<8x128xf32>
    %cst = arith.constant dense<0.000000e+00> : vector<8x256xf32>
    %12 = tpu.matmul %11, %10, %cst {dimension_numbers = #tpu.dot_dimension_numbers<[1], [0], [0], [1], [0, 0, 1, 1], [], []>} : vector<8x128xf32>, vector<128x256xf32>, vector<8x256xf32> -> vector<8x256xf32>
    %c0_5 = arith.constant 0 : index
    %c0_6 = arith.constant 0 : index
    %13 = vector.load %arg4[%c0_5, %c0_6] : memref<8x8xf32, #tpu.memory_space<vmem>>, vector<8x8xf32>
    %cst_7 = arith.constant dense<0.000000e+00> : vector<8x256xf32>
    %14 = tpu.matmul %13, %0, %cst_7 {dimension_numbers = #tpu.dot_dimension_numbers<[1], [0], [0], [1], [0, 0, 1, 1], [], []>} : vector<8x8xf32>, vector<8x256xf32>, vector<8x256xf32> -> vector<8x256xf32>
    %15 = arith.addf %12, %14 : vector<8x256xf32>
    %c0_8 = arith.constant 0 : index
    %c0_9 = arith.constant 0 : index
    %16 = vector.load %arg5[%c0_8, %c0_9] : memref<8x16xf32, #tpu.memory_space<vmem>>, vector<8x16xf32>
    %cst_10 = arith.constant dense<0.000000e+00> : vector<8x256xf32>
    %17 = tpu.matmul %16, %1, %cst_10 {dimension_numbers = #tpu.dot_dimension_numbers<[1], [0], [0], [1], [0, 0, 1, 1], [], []>} : vector<8x16xf32>, vector<16x256xf32>, vector<8x256xf32> -> vector<8x256xf32>
    %18 = arith.addf %15, %17 : vector<8x256xf32>
    %c0_11 = arith.constant 0 : index
    %c0_12 = arith.constant 0 : index
    %19 = vector.load %arg6[%c0_11, %c0_12] : memref<8x1xf32, #tpu.memory_space<vmem>>, vector<8x1xf32>
    %20 = vector.broadcast %19 : vector<8x1xf32> to vector<8x256xf32>
    %21 = arith.addf %18, %20 : vector<8x256xf32>
    %c0_13 = arith.constant 0 : index
    %c0_14 = arith.constant 0 : index
    %22 = vector.load %arg7[%c0_13, %c0_14] : memref<8x256xf32, #tpu.memory_space<vmem>>, vector<8x256xf32>
    tpu.vector_store %arg7[%c0_13, %c0_14], %21 {strides = array<i32>} : memref<8x256xf32, #tpu.memory_space<vmem>>, vector<8x256xf32>,
    return
  }
  func.func @transform_0(%arg0: i32) -> (i32, i32) {
    %c0_i32 = arith.constant 0 : i32
    %c0_i32_0 = arith.constant 0 : i32
    return %c0_i32, %arg0 : i32, i32
  }
  func.func @transform_1(%arg0: i32) -> (i32, i32) {
    %c0_i32 = arith.constant 0 : i32
    %c0_i32_0 = arith.constant 0 : i32
    return %c0_i32, %arg0 : i32, i32
  }
  func.func @transform_2(%arg0: i32) -> (i32, i32) {
    %c0_i32 = arith.constant 0 : i32
    %c0_i32_0 = arith.constant 0 : i32
    %c0_i32_1 = arith.constant 0 : i32
    return %c0_i32, %c0_i32_0 : i32, i32
  }
  func.func @transform_3(%arg0: i32) -> (i32, i32) {
    %c0_i32 = arith.constant 0 : i32
    %c0_i32_0 = arith.constant 0 : i32
    %c0_i32_1 = arith.constant 0 : i32
    return %c0_i32, %c0_i32_0 : i32, i32
  }
  func.func @transform_4(%arg0: i32) -> (i32, i32) {
    %c0_i32 = arith.constant 0 : i32
    %c0_i32_0 = arith.constant 0 : i32
    %c0_i32_1 = arith.constant 0 : i32
    return %c0_i32, %c0_i32_0 : i32, i32
  }
  func.func @transform_5(%arg0: i32) -> (i32, i32) {
    %c0_i32 = arith.constant 0 : i32
    %c0_i32_0 = arith.constant 0 : i32
    %c0_i32_1 = arith.constant 0 : i32
    return %c0_i32, %c0_i32_0 : i32, i32
  }
  func.func @transform_6(%arg0: i32) -> (i32, i32) {
    %c0_i32 = arith.constant 0 : i32
    %c0_i32_0 = arith.constant 0 : i32
    return %c0_i32, %arg0 : i32, i32
  }
}

</mosaic_0001>

<bundles_post_ra>
// kernel: parametrized_net_forward.1
= control target key start
LH: loop header
LB: loop body
LE: loop exit
PB: predicated region body
PF: predicated region fallthrough
CT: control target
= control target key end

     0   :  { %v36_v0 = vlaneseq  ;;  %v481_v4 = vmov 1966171168   ;;  %v482_v6 = vmov 0.0   ;;  %vm195_vm0 = vcmask 64512   ;;  %s620_s0 = inlined_call_operand.vmem [shape: f32[8,256], index: 0, kind: input, shape index: {}]   ;;  %s621_s1 = inlined_call_operand.vmem [shape: f32[16,256], index: 1, kind: input, shape index: {}]   ;;  %s622_s3 = inlined_call_operand.vmem [shape: f32[8,8], index: 3, kind: input, shape index: {}]   ;;  %s623_s5 = inlined_call_operand.vmem [shape: f32[8,1], index: 5, kind: input, shape index: {}]   ;;  %s624_s4 = inlined_call_operand.vmem [shape: f32[8,16], index: 4, kind: input, shape index: {}]   ;;  %s625_s2 = inlined_call_operand.vmem [shape: f32[8,128], index: 2, kind: input, shape index: {}]   ;;  %s626_s6 = inlined_call_operand.vmem [shape: f32[8,256], index: 6, kind: output, shape index: {}]  }
   0x1   :  { %v23_v1 = vld [vmem:[%s620_s0] sm:$0xff]  ;;  %v24_v2 = vld [vmem:[%s620_s0 + $0x8] sm:$0xff]  ;;  %v34_v5 = vunpack.c.l.s4 %v481_v4  ;;  %263 = vmatprep.mubr.f32.mxu0 %v482_v6  ;;  %334 = vmatprep.mubr.f32.mxu1 %v482_v6  ;;  %v533_v7 = vld [vmem:[%s621_s1 + $0x18] sm:$0xff]  ;;  %v483_v12 = vmov 0   ;;  %vm342_vm1 = vcmask 130048  }
   0x2   :  { %v528_v3 = vld [vmem:[%s621_s1 + $0x8] sm:$0xff]  ;;  %v31_v8 = vcombine.low %v23_v1, %v24_v2  ;;  %v37_v9 = vshrl.u32 %v36_v0, 7  ;;  %v538_v10 = vld [vmem:[%s621_s1] sm:$0xff]  ;;  %v543_v11 = vld [vmem:[%s621_s1 + $0x10] sm:$0xff]  ;;  %199 = vmatprep.subr.mxu0 %v24_v2  ;;  %478 = vset.pattern.permute.xlu0 %v483_v12  ;;  %v32_v14 = vcombine.high %v23_v1, %v24_v2 }
   0x3   :  { %v35_v13 = vunpack.c.0.s8 %v34_v5  ;;  %200 = vmatpush1.msra.mxu0 %v23_v1  ;;  %v194_v15 = vld [vmem:[%s622_s3] sm:$0xff]  ;;  %v467_v16 = vpack.c.bf16 %v533_v7, %v528_v3  ;;  %v469_v17 = vpack.c.bf16 %v543_v11, %v538_v10 }
   0x4   :  { %433 = vmatmul.mubr.msk.f32.vlgmr.msra.gmra.mrb[0].mxu0 %vm195_vm0, %v194_v15  ;;  %v419_v18 = vld [vmem:[%s623_s5] sm:$0xff]  ;;  %v559_v22 = vsub.s32 0, %v37_v9  ;;  %v561_v23 = vsub.s32 1, %v37_v9 }
   0x5   :  { %v38_v19 = vsub.s32 %v35_v13, %v37_v9  ;;  %468 = vmatprep.subr.bf16.mxu0 %v467_v16  ;;  %410 = vmatprep.mubr.f32.mxu0 %v482_v6  ;;  %v341_v20 = vld [vmem:[%s624_s4] sm:$0xff] }
   0x6   :  { %470 = vmatpush1.bf16.msra.mxu0 %v469_v17  ;;  %422 = vperm.xlu0 %478, %v419_v18  }
   0x7   :  { %v39_v21 = vrot.slane %v31_v8, %v38_v19  ;;  %v46_v24 = vrot.slane %v32_v14, %v38_v19 }
   0x9   :  { %v47_v25 = vcombine.high %v39_v21, %v39_v21  ;;  %v55_v26 = vrot.slane %v39_v21, %v38_v19  ;;  %434 = vmatmul.mubr.msk.f32.vlgmr.msra.gmra.mrb[2].mxu0 %vm342_vm1, %v341_v20  ;;  %v62_v27 = vrot.slane %v46_v24, %v38_v19  ;;  %v48_v32 = vcombine.high %v46_v24, %v46_v24 }
   0xb   :  { %v88_v28 = vrot.slane %v55_v26, %v561_v23  ;;  %v84_v29 = vrot.slane %v55_v26, %v559_v22  ;;  %v69_v30 = vrot.slane %v47_v25, %v38_v19  ;;  %v77_v31 = vcombine.high %v55_v26, %v55_v26 }
   0xc   :  { %v120_v44 = vrot.slane %v62_v27, %v561_v23  ;;  %v76_v58 = vrot.slane %v48_v32, %v38_v19  ;;  %v116_v62 = vrot.slane %v62_v27, %v559_v22  ;;  %v78_v6 = vcombine.high %v62_v27, %v62_v27 }
   0xd   :  { %v162_v33 = vmul.f32 %v88_v28, %v528_v3  ;;  %v164_v34 = vmul.f32 %v88_v28, %v533_v7  ;;  %v161_v35 = vmul.f32 %v84_v29, %v538_v10  ;;  %v163_v36 = vmul.f32 %v84_v29, %v543_v11 }
   0xe   :  { %v96_v37 = vrot.slane %v69_v30, %v561_v23  ;;  %v92_v38 = vrot.slane %v69_v30, %v559_v22  ;;  %v104_v39 = vrot.slane %v77_v31, %v561_v23  ;;  %v100_v40 = vrot.slane %v77_v31, %v559_v22 }
   0xf   :  { %v435_v41 = vpack.c.bf16 %v164_v34, %v162_v33  ;;  %v437_v42 = vpack.c.bf16 %v163_v36, %v161_v35  ;;  %v79_v43 = vcombine.high %v69_v30, %v69_v30  ;;  %v178_v61 = vmul.f32 %v120_v44, %v528_v3 }
  0x10   :  { %v166_v45 = vmul.f32 %v96_v37, %v528_v3  ;;  %v168_v46 = vmul.f32 %v96_v37, %v533_v7  ;;  %v165_v47 = vmul.f32 %v92_v38, %v538_v10  ;;  %v167_v48 = vmul.f32 %v92_v38, %v543_v11 }
  0x11   :  { %436 = vmatprep.subr.bf16.mxu1 %v435_v41  ;;  %v170_v49 = vmul.f32 %v104_v39, %v528_v3  ;;  %v172_v50 = vmul.f32 %v104_v39, %v533_v7  ;;  %v169_v51 = vmul.f32 %v100_v40, %v538_v10  ;;  %v171_v52 = vmul.f32 %v100_v40, %v543_v11 }
  0x12   :  { %438 = vmatpush1.bf16.msra.mxu1 %v437_v42  ;;  %v439_v53 = vpack.c.bf16 %v168_v46, %v166_v45  ;;  %v441_v54 = vpack.c.bf16 %v167_v48, %v165_v47  ;;  %v112_v55 = vrot.slane %v79_v43, %v561_v23  ;;  %v108_v56 = vrot.slane %v79_v43, %v559_v22 }
  0x13   :  { %v443_v57 = vpack.c.bf16 %v172_v50, %v170_v49  ;;  %v445_v63 = vpack.c.bf16 %v171_v52, %v169_v51  ;;  %v180_v2 = vmul.f32 %v120_v44, %v533_v7  ;;  %v128_v5 = vrot.slane %v76_v58, %v561_v23 }
  0x14   :  { %440 = vmatprep.subr.bf16.mxu1 %v439_v53  ;;  %v174_v59 = vmul.f32 %v112_v55, %v528_v3  ;;  %v176_v60 = vmul.f32 %v112_v55, %v533_v7  ;;  %v173_v0 = vmul.f32 %v108_v56, %v538_v10  ;;  %v175_v1 = vmul.f32 %v108_v56, %v543_v11 }
  0x15   :  { %v177_v8 = vmul.f32 %v116_v62, %v538_v10  ;;  %v451_v12 = vpack.c.bf16 %v180_v2, %v178_v61  ;;  %v179_v13 = vmul.f32 %v116_v62, %v543_v11  ;;  %v124_v14 = vrot.slane %v76_v58, %v559_v22 }
  0x16   :  { %442 = vmatpush1.bf16.msra.mxu1 %v441_v54  ;;  %v447_v4 = vpack.c.bf16 %v176_v60, %v174_v59  ;;  %v449_v9 = vpack.c.bf16 %v175_v1, %v173_v0  ;;  %v182_v15 = vmul.f32 %v128_v5, %v528_v3  ;;  %v184_v16 = vmul.f32 %v128_v5, %v533_v7 }
  0x17   :  { %444 = vmatprep.subr.bf16.mxu1 %v443_v57  ;;  %v136_v17 = vrot.slane %v78_v6, %v561_v23  ;;  %v80_v18 = vcombine.high %v76_v58, %v76_v58  ;;  %v453_v19 = vpack.c.bf16 %v179_v13, %v177_v8  ;;  %v181_v20 = vmul.f32 %v124_v14, %v538_v10 }
  0x18   :  { %v183_v21 = vmul.f32 %v124_v14, %v543_v11  ;;  %v132_v24 = vrot.slane %v78_v6, %v559_v22  ;;  %v455_v25 = vpack.c.bf16 %v184_v16, %v182_v15 }
  0x19   :  { %v186_v26 = vmul.f32 %v136_v17, %v528_v3  ;;  %v188_v27 = vmul.f32 %v136_v17, %v533_v7  ;;  %v144_v28 = vrot.slane %v80_v18, %v561_v23  ;;  %v140_v32 = vrot.slane %v80_v18, %v559_v22  ;;  %v193_v22 = vld [vmem:[%s625_s2] sm:$0xff] }
  0x1a   :  { %446 = vmatpush1.bf16.msra.mxu1 %v445_v63  ;;  %v457_v29 = vpack.c.bf16 %v183_v21, %v181_v20  ;;  %v185_v30 = vmul.f32 %v132_v24, %v538_v10  ;;  %v187_v31 = vmul.f32 %v132_v24, %v543_v11 }
  0x1b   :  { %448 = vmatprep.subr.bf16.mxu1 %v447_v4  ;;  %v459_v33 = vpack.c.bf16 %v188_v27, %v186_v26  ;;  %v190_v34 = vmul.f32 %v144_v28, %v528_v3  ;;  %v192_v35 = vmul.f32 %v144_v28, %v533_v7  ;;  %v189_v37 = vmul.f32 %v140_v32, %v538_v10 }
  0x1c   :  { %v461_v36 = vpack.c.bf16 %v187_v31, %v185_v30  ;;  %v191_v23 = vmul.f32 %v140_v32, %v543_v11 }
  0x1d   :  { %v463_v38 = vpack.c.bf16 %v192_v35, %v190_v34 }
  0x1e   :  { %450 = vmatpush1.bf16.msra.mxu1 %v449_v9  ;;  %v465_v39 = vpack.c.bf16 %v191_v23, %v189_v37 }
  0x1f   :  { %452 = vmatprep.subr.bf16.mxu1 %v451_v12 }
  0x22   :  { %454 = vmatpush1.bf16.msra.mxu1 %v453_v19 }
  0x23   :  { %456 = vmatprep.subr.bf16.mxu1 %v455_v25 }
  0x26   :  { %458 = vmatpush1.bf16.msra.mxu1 %v457_v29 }
  0x27   :  { %460 = vmatprep.subr.bf16.mxu1 %v459_v33 }
  0x2a   :  { %462 = vmatpush1.bf16.msra.mxu1 %v461_v36 }
  0x2b   :  { %464 = vmatprep.subr.bf16.mxu1 %v463_v38 }
  0x2e   :  { %466 = vmatpush1.bf16.msra.mxu1 %v465_v39 }
  0x31   :  { %335 = vmatmul.mubr.f32.vlgmr.msra.gmra.mrb[0].mxu1 %v193_v22 }
  0x85   :  { %v423_v11 = vpop.permute.xlu0 %422 }
  0xd7   :  { %v265_v3 = vpop.f32.mrb[0].mxu0 }
  0xd8   :  { %v267_v40 = vpop.f32.mrb[1].mxu0 }
  0xdc   :  { %v412_v7 = vpop.f32.mrb[2].mxu0 }
  0xdd   :  { %v414_v41 = vpop.f32.mrb[3].mxu0 }
 0x104   :  { %v336_v42 = vpop.f32.mrb[0].mxu1 }
 0x105   :  { %v337_v43 = vadd.f32 %v336_v42, %v265_v3  ;;  %v338_v10 = vpop.f32.mrb[1].mxu1 }
 0x106   :  { %v339_v44 = vadd.f32 %v338_v10, %v267_v40 }
 0x107   :  { %v417_v45 = vadd.f32 %v412_v7, %v337_v43 }
 0x108   :  { %v418_v46 = vadd.f32 %v414_v41, %v339_v44 }
 0x109   :  { %v425_v47 = vadd.f32 %v423_v11, %v417_v45 }
 0x10a   :  { %v426_v48 = vadd.f32 %v423_v11, %v418_v46 }
 0x10b   :  { %427 = vst [vmem:[%s626_s6] sm:$0xff] %v425_v47 }
 0x10c   :  { %428 = vst [vmem:[%s626_s6 + $0x8] sm:$0xff] %v426_v48 }

</bundles_post_ra>
